<compile_context>
chip_gen: v6e
topology: v6e:2x2x1
jax: 0.10.0
libtpu: 0.0.40
codegen_flags: <defaults>
</compile_context>

<pallas_src>
import jax
import jax.numpy as jnp
from jax.experimental import pallas as pl
from jax.experimental.pallas import tpu as pltpu

# Constant index tensor from the PyTorch module: torch.tensor([0, 2]).
_INDICES = (0, 2)


def _make_gather_kernel(indices):
    """Build a single-invocation HBM->HBM row-gather kernel for static indices."""

    def kernel(x_hbm, o_hbm, sems):
        # Issue every row copy before waiting on any of them so all DMAs are
        # in flight together (pure DMA kernel: no VMEM staging, no vector-slot
        # work in the body).
        copies = []
        for i, src in enumerate(indices):
            cp = pltpu.make_async_copy(x_hbm.at[src], o_hbm.at[i], sems.at[i])
            cp.start()
            copies.append(cp)
        for cp in copies:
            cp.wait()

    return kernel


def index_tensor(x: jax.Array, indices=_INDICES) -> jax.Array:
    """Equivalent of PyTorch `x[torch.tensor([0, 2])]` (static-index gather).

    `indices` must be static Python ints, each in [0, x.shape[0]) — validated
    here at trace time since there is no in-kernel bounds check on DMAs.
    """
    idx = tuple(int(i) for i in indices)
    n_src = x.shape[0]
    for i in idx:
        if not (0 <= i < n_src):
            raise ValueError(f"index {i} out of range for dim of size {n_src}")

    n_out = len(idx)
    out_shape = jax.ShapeDtypeStruct((n_out,) + tuple(x.shape[1:]), x.dtype)

    return pl.pallas_call(
        _make_gather_kernel(idx),
        out_shape=out_shape,
        # Both operands stay in HBM; the kernel moves data purely via DMA.
        in_specs=[pl.BlockSpec(memory_space=pl.ANY)],
        out_specs=pl.BlockSpec(memory_space=pl.ANY),
        scratch_shapes=[pltpu.SemaphoreType.DMA((n_out,))],
    )(x)


if __name__ == "__main__":
    key = jax.random.PRNGKey(0)
    # Small shape consistent with the forward: first dim >= 3 so that indices
    # [0, 2] are valid.  (N, H, W) = (4, 8, 128) keeps each gathered row a
    # full (8, 128) f32 tile (lane-dense, no masked stores anywhere).
    x = jax.random.normal(key, (4, 8, 128), dtype=jnp.float32)

    y = index_tensor(x)
    y = jax.block_until_ready(y)

    # Reference check against plain JAX gather (== torch x[[0, 2]] semantics).
    ref = x[jnp.array([0, 2])]
    assert y.shape == (2, 8, 128), y.shape
    assert y.dtype == x.dtype
    assert bool(jnp.array_equal(y, ref))

    print("KERNEL_OK")
</pallas_src>

<mosaic_0001>
module attributes {stable_mosaic.version = 11 : i64} {
  func.func @kernel(%arg0: memref<4x8x128xf32, #tpu.memory_space<any>>, %arg1: memref<2x8x128xf32, #tpu.memory_space<any>>, %arg2: memref<2x!tpu.dma_semaphore, #tpu.memory_space<semaphore_mem>>) attributes {dimension_semantics = [], scalar_prefetch = 0 : i64, scratch_operands = 1 : i64, tpu.core_type = #tpu.core_type<tc>} {
    %c0_i32 = arith.constant 0 : i32
    %c0_i32_0 = arith.constant 0 : i32
    %c0_i32_1 = arith.constant 0 : i32
    %c0_i32_2 = arith.constant 0 : i32
    %c0_i32_3 = arith.constant 0 : i32
    %0 = tpu.memref_slice %arg0[%c0_i32, %c0_i32_2, %c0_i32_3] : memref<4x8x128xf32, #tpu.memory_space<any>> -> memref<1x8x128xf32, #tpu.memory_space<any>>
    %1 = tpu.memref_squeeze %0 : memref<1x8x128xf32, #tpu.memory_space<any>> -> memref<8x128xf32, #tpu.memory_space<any>>
    %c0_i32_4 = arith.constant 0 : i32
    %c0_i32_5 = arith.constant 0 : i32
    %2 = tpu.memref_slice %arg1[%c0_i32_0, %c0_i32_4, %c0_i32_5] : memref<2x8x128xf32, #tpu.memory_space<any>> -> memref<1x8x128xf32, #tpu.memory_space<any>>
    %3 = tpu.memref_squeeze %2 : memref<1x8x128xf32, #tpu.memory_space<any>> -> memref<8x128xf32, #tpu.memory_space<any>>
    %4 = tpu.memref_slice %arg2[%c0_i32_1] : memref<2x!tpu.dma_semaphore, #tpu.memory_space<semaphore_mem>> -> memref<1x!tpu.dma_semaphore, #tpu.memory_space<semaphore_mem>>
    %5 = tpu.memref_squeeze %4 : memref<1x!tpu.dma_semaphore, #tpu.memory_space<semaphore_mem>> -> memref<!tpu.dma_semaphore, #tpu.memory_space<semaphore_mem>>
    tpu.enqueue_dma source(%1 : memref<8x128xf32, #tpu.memory_space<any>>) target(%3 : memref<8x128xf32, #tpu.memory_space<any>>) target_semaphore(%5 : memref<!tpu.dma_semaphore, #tpu.memory_space<semaphore_mem>>)
    %c2_i32 = arith.constant 2 : i32
    %c1_i32 = arith.constant 1 : i32
    %c1_i32_6 = arith.constant 1 : i32
    %c0_i32_7 = arith.constant 0 : i32
    %c0_i32_8 = arith.constant 0 : i32
    %6 = tpu.memref_slice %arg0[%c2_i32, %c0_i32_7, %c0_i32_8] : memref<4x8x128xf32, #tpu.memory_space<any>> -> memref<1x8x128xf32, #tpu.memory_space<any>>
    %7 = tpu.memref_squeeze %6 : memref<1x8x128xf32, #tpu.memory_space<any>> -> memref<8x128xf32, #tpu.memory_space<any>>
    %c0_i32_9 = arith.constant 0 : i32
    %c0_i32_10 = arith.constant 0 : i32
    %8 = tpu.memref_slice %arg1[%c1_i32, %c0_i32_9, %c0_i32_10] : memref<2x8x128xf32, #tpu.memory_space<any>> -> memref<1x8x128xf32, #tpu.memory_space<any>>
    %9 = tpu.memref_squeeze %8 : memref<1x8x128xf32, #tpu.memory_space<any>> -> memref<8x128xf32, #tpu.memory_space<any>>
    %10 = tpu.memref_slice %arg2[%c1_i32_6] : memref<2x!tpu.dma_semaphore, #tpu.memory_space<semaphore_mem>> -> memref<1x!tpu.dma_semaphore, #tpu.memory_space<semaphore_mem>>
    %11 = tpu.memref_squeeze %10 : memref<1x!tpu.dma_semaphore, #tpu.memory_space<semaphore_mem>> -> memref<!tpu.dma_semaphore, #tpu.memory_space<semaphore_mem>>
    tpu.enqueue_dma source(%7 : memref<8x128xf32, #tpu.memory_space<any>>) target(%9 : memref<8x128xf32, #tpu.memory_space<any>>) target_semaphore(%11 : memref<!tpu.dma_semaphore, #tpu.memory_space<semaphore_mem>>)
    %c0_i32_11 = arith.constant 0 : i32
    %c0_i32_12 = arith.constant 0 : i32
    %c0_i32_13 = arith.constant 0 : i32
    %c0_i32_14 = arith.constant 0 : i32
    %c0_i32_15 = arith.constant 0 : i32
    %12 = tpu.memref_slice %arg0[%c0_i32_11, %c0_i32_14, %c0_i32_15] : memref<4x8x128xf32, #tpu.memory_space<any>> -> memref<1x8x128xf32, #tpu.memory_space<any>>
    %13 = tpu.memref_squeeze %12 : memref<1x8x128xf32, #tpu.memory_space<any>> -> memref<8x128xf32, #tpu.memory_space<any>>
    %c0_i32_16 = arith.constant 0 : i32
    %c0_i32_17 = arith.constant 0 : i32
    %14 = tpu.memref_slice %arg1[%c0_i32_12, %c0_i32_16, %c0_i32_17] : memref<2x8x128xf32, #tpu.memory_space<any>> -> memref<1x8x128xf32, #tpu.memory_space<any>>
    %15 = tpu.memref_squeeze %14 : memref<1x8x128xf32, #tpu.memory_space<any>> -> memref<8x128xf32, #tpu.memory_space<any>>
    %16 = tpu.memref_slice %arg2[%c0_i32_13] : memref<2x!tpu.dma_semaphore, #tpu.memory_space<semaphore_mem>> -> memref<1x!tpu.dma_semaphore, #tpu.memory_space<semaphore_mem>>
    %17 = tpu.memref_squeeze %16 : memref<1x!tpu.dma_semaphore, #tpu.memory_space<semaphore_mem>> -> memref<!tpu.dma_semaphore, #tpu.memory_space<semaphore_mem>>
    tpu.wait_dma2 semaphore(%17 : memref<!tpu.dma_semaphore, #tpu.memory_space<semaphore_mem>>) src(%13 : memref<8x128xf32, #tpu.memory_space<any>>) dst(%15 : memref<8x128xf32, #tpu.memory_space<any>>)
    %c2_i32_18 = arith.constant 2 : i32
    %c1_i32_19 = arith.constant 1 : i32
    %c1_i32_20 = arith.constant 1 : i32
    %c0_i32_21 = arith.constant 0 : i32
    %c0_i32_22 = arith.constant 0 : i32
    %18 = tpu.memref_slice %arg0[%c2_i32_18, %c0_i32_21, %c0_i32_22] : memref<4x8x128xf32, #tpu.memory_space<any>> -> memref<1x8x128xf32, #tpu.memory_space<any>>
    %19 = tpu.memref_squeeze %18 : memref<1x8x128xf32, #tpu.memory_space<any>> -> memref<8x128xf32, #tpu.memory_space<any>>
    %c0_i32_23 = arith.constant 0 : i32
    %c0_i32_24 = arith.constant 0 : i32
    %20 = tpu.memref_slice %arg1[%c1_i32_19, %c0_i32_23, %c0_i32_24] : memref<2x8x128xf32, #tpu.memory_space<any>> -> memref<1x8x128xf32, #tpu.memory_space<any>>
    %21 = tpu.memref_squeeze %20 : memref<1x8x128xf32, #tpu.memory_space<any>> -> memref<8x128xf32, #tpu.memory_space<any>>
    %22 = tpu.memref_slice %arg2[%c1_i32_20] : memref<2x!tpu.dma_semaphore, #tpu.memory_space<semaphore_mem>> -> memref<1x!tpu.dma_semaphore, #tpu.memory_space<semaphore_mem>>
    %23 = tpu.memref_squeeze %22 : memref<1x!tpu.dma_semaphore, #tpu.memory_space<semaphore_mem>> -> memref<!tpu.dma_semaphore, #tpu.memory_space<semaphore_mem>>
    tpu.wait_dma2 semaphore(%23 : memref<!tpu.dma_semaphore, #tpu.memory_space<semaphore_mem>>) src(%19 : memref<8x128xf32, #tpu.memory_space<any>>) dst(%21 : memref<8x128xf32, #tpu.memory_space<any>>)
    return
  }
}

</mosaic_0001>

<bundles_post_ra>
// kernel: tpu_custom_call.1
= control target key start
LH: loop header
LB: loop body
LE: loop exit
PB: predicated region body
PF: predicated region fallthrough
CT: control target
= control target key end

     0   :  { %s51_s9 = smov [#allocation2]   ;;  %s52_s10 = smov 131072   ;;  %s77_s0 = inlined_call_operand.hbm [shape: f32[4,8,128], index: 0, kind: input, shape index: {}]   ;;  %s78_s1 = inlined_call_operand.hbm [shape: f32[2,8,128], index: 1, kind: output, shape index: {}]  }
   0x1   :  { %s13_s8 = scalar_lea.hbm %s77_s0, 256  ;;  %s53_s11 = smov 0  }
   0x2   :  { %12 = dma.general %s77_s0, 128, %s78_s1, %s51_s9, %s52_s10, [#allocation4], %s53_s11, 0  }
   0x3   :  { %s14_s18 = scalar_lea.hbm %s78_s1, 128  ;;  %s54_s19 = smov [#allocation2 + $0x1]  }
   0x4   :  { %22 = dma.general %s13_s8, 128, %s14_s18, %s54_s19, %s52_s10, [#allocation6], %s53_s11, 0  }
   0x5   :  { %47 = dma.done.wait [#allocation2], 128 }
   0x6   :  { %48 = vsyncadd [#allocation2], 4294967168 }
   0x7   :  { %49 = dma.done.wait [#allocation2 + $0x1], 128 }
   0x8   :  { %50 = vsyncadd [#allocation2 + $0x1], 4294967168 }
   0x9   :  { %28 = vsyncmov [#allocation2] }
   0xc   :  { %s29_s20 = vpop.sfrf %28 }
   0xd   :  { %p41_p0 = scmp.ne.s32.totalorder %s29_s20, 0 }
   0xf   :  { %33 = shalt.err (%p41_p0)  }
  0x10   :  { %35 = vsyncmov [#allocation2 + $0x1] }
  0x13   :  { %s36_s21 = vpop.sfrf %35 }
  0x14   :  { %p42_p1 = scmp.ne.s32.totalorder %s36_s21, 0 }
  0x16   :  { %40 = shalt.err (%p42_p1)  }

</bundles_post_ra>
